<compile_context>
chip_gen: v7x
topology: tpu7x:2x2x1
jax: 0.10.0
libtpu: 0.0.40
codegen_flags: <defaults>
</compile_context>

<pallas_src>
import jax
import jax.numpy as jnp
import numpy as np
from jax.experimental import pallas as pl
from jax.experimental.pallas import tpu as pltpu


# --------------------------------------------------------------------------
# helpers
# --------------------------------------------------------------------------
def _round_up(x, m):
    return ((x + m - 1) // m) * m


def _pad_axis(a, axis, new_size):
    if a.shape[axis] == new_size:
        return a
    pads = [(0, 0)] * a.ndim
    pads[axis] = (0, new_size - a.shape[axis])
    return jnp.pad(a, pads)


def _vmem_cap_bytes():
    # Generation-aware cap: 75% of per-core VMEM (v5e/v6e 128 MiB, v7x 64 MiB).
    try:
        cap = int(pltpu.get_tpu_info().vmem_capacity_bytes)
        if cap > 0:
            return int(cap * 0.75)
    except Exception:
        pass
    return 48 << 20   # conservative fallback: 75% of v7x's 64 MiB/TC


def _vmem_limit(nbytes):
    want = int(nbytes * 1.4) + (2 << 20)      # headroom for compiler scratch
    return int(min(max(want, 32 << 20), _vmem_cap_bytes()))


# --------------------------------------------------------------------------
# kernels
# --------------------------------------------------------------------------
def _pool_kernel(x_ref, o_ref):
    # x_ref block: (TBH, 2, Wp, 2*C) f32 -> 2x2 spatial average, bf16 out.
    # h-pair = leading dim (free index select); w-pair = two contiguous
    # C-wide lane halves -> two unmasked lane-aligned adds.
    x = x_ref[...]
    a = x[:, 0] + x[:, 1]                     # (TBH, Wp, 2*C)
    c = a.shape[-1] // 2
    o_ref[...] = ((a[..., :c] + a[..., c:]) * 0.25).astype(o_ref.dtype)


def _linear1_kernel(x_ref, w1_ref, b1_ref, h_ref, acc_ref):
    # First Linear: K-tiled accumulation on the MXU (bf16 x bf16 -> f32 acc).
    k = pl.program_id(2)

    @pl.when(k == 0)
    def _():
        acc_ref[...] = jnp.zeros_like(acc_ref)

    acc_ref[...] += jnp.dot(x_ref[...], w1_ref[...],
                            preferred_element_type=jnp.float32)

    @pl.when(k == pl.num_programs(2) - 1)
    def _():
        h_ref[...] = (acc_ref[...] + b1_ref[...]).astype(h_ref.dtype)


def _linear2_kernel(h_ref, w2_ref, b2_ref, o_ref):
    # Second Linear: tiled over the D2 (output) columns; single K pass.
    y = jnp.dot(h_ref[...], w2_ref[...], preferred_element_type=jnp.float32)
    o_ref[...] = (y + b2_ref[...]).astype(o_ref.dtype)


# --------------------------------------------------------------------------
# one-time parameter preparation (hoisted out of the forward)
# --------------------------------------------------------------------------
def prepare_projector_params(w1, b1, w2, b2):
    """Cast weights to bf16 and pad to 128-lane multiples ONCE.

    w1: (K, D1)  == PyTorch global_feature_extraction.weight.T
    b1: (D1,) or (1, D1)
    w2: (D1, D2) == PyTorch global_feature_mapping.weight.T
    b2: (D2,) or (1, D2)
    """
    K, D1 = w1.shape
    D2 = w2.shape[1]
    Kp, D1p, D2p = _round_up(K, 128), _round_up(D1, 128), _round_up(D2, 128)
    w1b = _pad_axis(_pad_axis(jnp.asarray(w1, jnp.bfloat16), 0, Kp), 1, D1p)
    w2b = _pad_axis(_pad_axis(jnp.asarray(w2, jnp.bfloat16), 0, D1p), 1, D2p)
    b1p = _pad_axis(jnp.asarray(b1, jnp.float32).reshape(1, D1), 1, D1p)
    b2p = _pad_axis(jnp.asarray(b2, jnp.float32).reshape(1, D2), 1, D2p)
    return {"w1": w1b, "b1": b1p, "w2": w2b, "b2": b2p, "D2": D2}


# --------------------------------------------------------------------------
# forward
# --------------------------------------------------------------------------
def multi_modal_projector(x, params, *, T, H, W, C):
    """x: (B, T, H, W, C) float32 (or reshapeable to it).  Returns (B, T, D2) f32.

    `params` must come from prepare_projector_params (bf16 weights at rest).
    """
    w1b, b1p = params["w1"], params["b1"]
    w2b, b2p = params["w2"], params["b2"]
    D2 = params["D2"]
    Kp, D1p = w1b.shape
    D2p = w2b.shape[1]

    B = x.shape[0]
    Hp, Wp = H // 2, W // 2
    K = Hp * Wp * C
    M = B * T
    MHp = M * Hp

    # ---- stage 1: 2x2 spatial average pool, channels-last, bf16 out --------
    # Free memory-order reshape: the inner w-pair merges with C on the lane
    # axis, the h-pair stays a leading dim (no sublane-2 padding waste).
    xr = x.reshape(MHp, 2, Wp, 2 * C)

    wp_pad = _round_up(Wp, 8)
    per_row = 2 * (2 * wp_pad * 2 * C * 4) + 2 * (wp_pad * C * 2)  # dbl-buffered
    tbh = 1
    for t in (64, 32, 16, 8, 4, 2):
        if MHp % t == 0 and t * per_row <= (24 << 20):
            tbh = t
            break

    pooled = pl.pallas_call(
        _pool_kernel,
        out_shape=jax.ShapeDtypeStruct((MHp, Wp, C), jnp.bfloat16),
        grid_spec=pltpu.PrefetchScalarGridSpec(
            num_scalar_prefetch=0,
            grid=(MHp // tbh,),
            in_specs=[pl.BlockSpec((tbh, 2, Wp, 2 * C),
                                   lambda i: (i, 0, 0, 0))],
            out_specs=pl.BlockSpec((tbh, Wp, C), lambda i: (i, 0, 0)),
        ),
        compiler_params=pltpu.CompilerParams(
            dimension_semantics=("parallel",),
            vmem_limit_bytes=_vmem_limit(tbh * per_row)),
    )(xr)

    # flatten order (hp, wp, c) matches torch .reshape(B, 24, -1); free reshape.
    flat = pooled.reshape(M, K)

    # ---- tiling -------------------------------------------------------------
    # One M tile up to 512 rows (padded to 16-row bf16 sublane pairs): W1 is
    # streamed once per M tile, so fewer / larger tiles win.
    tm = min(_round_up(M, 16), 512)
    Mp = _round_up(M, tm)

    tk = 128
    for c in (2048, 1024, 512, 256, 128):
        if Kp % c == 0:
            tk = c
            break

    # Linear1 N tile = full D1 when the (tk, D1) W1 tile fits: the activation
    # index_map ignores j, so any D1 split re-streams the (tm, K) slab per
    # extra N tile (pure wasted HBM reads in a BW-bound stage).
    if 2 * tk * D1p * 2 <= (20 << 20):
        tn1 = D1p
    else:
        tn1 = 128
        for c in (2048, 1024, 512, 256, 128):
            if D1p % c == 0 and 2 * tk * c * 2 <= (20 << 20):
                tn1 = c
                break

    # Linear2's h block index is constant across the D2 axis (no re-stream),
    # so D2 may be tiled freely; cap the double-buffered W2 tile at ~16 MiB.
    tn2 = 128
    for c in (2048, 1024, 512, 256, 128):
        if D2p % c == 0 and 2 * D1p * c * 2 <= (16 << 20):
            tn2 = c
            break

    # zero padding contributes nothing to the matmuls.
    flat = _pad_axis(_pad_axis(flat, 1, Kp), 0, Mp)

    # ---- stage 2: first Linear (K-tiled W1 streaming, f32 accumulator) ------
    vmem_a = (2 * tm * tk * 2        # activation tiles (bf16, double-buffered)
              + 2 * tk * tn1 * 2     # W1 tiles (bf16, double-buffered)
              + 2 * tn1 * 4          # b1
              + 2 * tm * tn1 * 2     # h output tiles
              + tm * tn1 * 4)        # f32 accumulator
    h = pl.pallas_call(
        _linear1_kernel,
        out_shape=jax.ShapeDtypeStruct((Mp, D1p), jnp.bfloat16),
        grid_spec=pltpu.PrefetchScalarGridSpec(
            num_scalar_prefetch=0,
            grid=(Mp // tm, D1p // tn1, Kp // tk),
            in_specs=[
                pl.BlockSpec((tm, tk), lambda i, j, k: (i, k)),    # activations
                pl.BlockSpec((tk, tn1), lambda i, j, k: (k, j)),   # W1 tile
                pl.BlockSpec((1, tn1), lambda i, j, k: (0, j)),    # b1 tile
            ],
            out_specs=pl.BlockSpec((tm, tn1), lambda i, j, k: (i, j)),
            scratch_shapes=[pltpu.VMEM((tm, tn1), jnp.float32)],
        ),
        compiler_params=pltpu.CompilerParams(
            dimension_semantics=("parallel", "parallel", "arbitrary"),
            vmem_limit_bytes=_vmem_limit(vmem_a)),
    )(flat, w1b, b1p)

    # ---- stage 3: second Linear, tiled over D2 (W2 never fully resident) ----
    vmem_b = (2 * tm * D1p * 2       # h tiles
              + 2 * D1p * tn2 * 2    # W2 tiles
              + 2 * tn2 * 4          # b2
              + 2 * tm * tn2 * 4)    # f32 output tiles
    out = pl.pallas_call(
        _linear2_kernel,
        out_shape=jax.ShapeDtypeStruct((Mp, D2p), jnp.float32),
        grid_spec=pltpu.PrefetchScalarGridSpec(
            num_scalar_prefetch=0,
            grid=(Mp // tm, D2p // tn2),
            in_specs=[
                pl.BlockSpec((tm, D1p), lambda i, j: (i, 0)),      # h
                pl.BlockSpec((D1p, tn2), lambda i, j: (0, j)),     # W2 tile
                pl.BlockSpec((1, tn2), lambda i, j: (0, j)),       # b2 tile
            ],
            out_specs=pl.BlockSpec((tm, tn2), lambda i, j: (i, j)),
        ),
        compiler_params=pltpu.CompilerParams(
            dimension_semantics=("parallel", "parallel"),
            vmem_limit_bytes=_vmem_limit(vmem_b)),
    )(h, w2b, b2p)

    return out[:M, :D2].reshape(B, T, D2)


# --------------------------------------------------------------------------
# reference + test
# --------------------------------------------------------------------------
def _reference(x, w1, b1, w2, b2, *, T, H, W, C):
    B = x.shape[0]
    att = x.reshape(B, T, H, W, C)
    pooled = att.reshape(B, T, H // 2, 2, W // 2, 2, C).mean(axis=(3, 5))
    flat = pooled.reshape(B, T, -1)
    h = flat @ w1 + b1.reshape(-1)
    return h @ w2 + b2.reshape(-1)


if __name__ == "__main__":
    # Small shapes structurally consistent with the module.
    # (Original module: T=24, H=W=14, C=2048, D1=2048, D2=4096 — same code path.)
    B, T, H, W, C = 2, 6, 4, 4, 128
    D1, D2 = 128, 256
    K = (H // 2) * (W // 2) * C

    key = jax.random.PRNGKey(0)
    kx, k1, k2, k3, k4 = jax.random.split(key, 5)
    x = jax.random.normal(kx, (B, T, H, W, C), dtype=jnp.float32)
    w1 = jax.random.normal(k1, (K, D1), dtype=jnp.float32) * 0.02
    b1 = jax.random.normal(k2, (1, D1), dtype=jnp.float32) * 0.02
    w2 = jax.random.normal(k3, (D1, D2), dtype=jnp.float32) * 0.02
    b2 = jax.random.normal(k4, (1, D2), dtype=jnp.float32) * 0.02

    # One-time weight preparation (bf16 cast + pad) — hoisted out of the call.
    params = prepare_projector_params(w1, b1, w2, b2)

    out = multi_modal_projector(x, params, T=T, H=H, W=W, C=C)
    out = jax.block_until_ready(out)

    ref = _reference(x, w1, b1, w2, b2, T=T, H=H, W=W, C=C)
    assert out.shape == (B, T, D2), out.shape
    # Tolerance matches the intentional bf16 weight/activation cast
    # (f32 accumulation on the MXU).
    np.testing.assert_allclose(np.asarray(out), np.asarray(ref),
                               rtol=2e-2, atol=2e-2)
    print("KERNEL_OK")
</pallas_src>

<mosaic_0001>
module attributes {stable_mosaic.version = 11 : i64} {
  func.func @_pool_kernel(%arg0: i32, %arg1: memref<8x2x2x256xf32, #tpu.memory_space<vmem>>, %arg2: memref<8x2x128xbf16, #tpu.memory_space<vmem>>) attributes {dimension_semantics = [#tpu.dimension_semantics<parallel>], iteration_bounds = array<i64: 3>, scalar_prefetch = 0 : i64, scratch_operands = 0 : i64, tpu.core_type = #tpu.core_type<tc>, window_params = [{transform_indices = @transform_0, window_bounds = array<i64: 8, 2, 2, 256>}, {transform_indices = @transform_1, window_bounds = array<i64: 8, 2, 128>}]} {
    %c0 = arith.constant 0 : index
    %c0_0 = arith.constant 0 : index
    %c0_1 = arith.constant 0 : index
    %c0_2 = arith.constant 0 : index
    %0 = vector.load %arg1[%c0, %c0_0, %c0_1, %c0_2] : memref<8x2x2x256xf32, #tpu.memory_space<vmem>>, vector<8x2x2x256xf32>
    %1 = vector.extract_strided_slice %0 {offsets = [0, 0, 0, 0], sizes = [8, 1, 2, 256], strides = [1, 1, 1, 1]} : vector<8x2x2x256xf32> to vector<8x1x2x256xf32>
    %2 = vector.shape_cast %1 : vector<8x1x2x256xf32> to vector<8x2x256xf32>
    %3 = vector.extract_strided_slice %0 {offsets = [0, 1, 0, 0], sizes = [8, 1, 2, 256], strides = [1, 1, 1, 1]} : vector<8x2x2x256xf32> to vector<8x1x2x256xf32>
    %4 = vector.shape_cast %3 : vector<8x1x2x256xf32> to vector<8x2x256xf32>
    %5 = arith.addf %2, %4 : vector<8x2x256xf32>
    %6 = vector.extract_strided_slice %5 {offsets = [0, 0, 0], sizes = [8, 2, 128], strides = [1, 1, 1]} : vector<8x2x256xf32> to vector<8x2x128xf32>
    %7 = vector.extract_strided_slice %5 {offsets = [0, 0, 128], sizes = [8, 2, 128], strides = [1, 1, 1]} : vector<8x2x256xf32> to vector<8x2x128xf32>
    %8 = arith.addf %6, %7 : vector<8x2x128xf32>
    %cst = arith.constant 2.500000e-01 : f32
    %9 = vector.broadcast %cst : f32 to vector<8x2x128xf32>
    %10 = arith.mulf %8, %9 : vector<8x2x128xf32>
    %11 = arith.truncf %10 : vector<8x2x128xf32> to vector<8x2x128xbf16>
    %c0_3 = arith.constant 0 : index
    %c0_4 = arith.constant 0 : index
    %c0_5 = arith.constant 0 : index
    %12 = vector.load %arg2[%c0_3, %c0_4, %c0_5] : memref<8x2x128xbf16, #tpu.memory_space<vmem>>, vector<8x2x128xbf16>
    tpu.vector_store %arg2[%c0_3, %c0_4, %c0_5], %11 {strides = array<i32>} : memref<8x2x128xbf16, #tpu.memory_space<vmem>>, vector<8x2x128xbf16>,
    return
  }
  func.func @transform_0(%arg0: i32) -> (i32, i32, i32, i32) {
    %c0_i32 = arith.constant 0 : i32
    %c0_i32_0 = arith.constant 0 : i32
    %c0_i32_1 = arith.constant 0 : i32
    %c0_i32_2 = arith.constant 0 : i32
    return %arg0, %c0_i32, %c0_i32_0, %c0_i32_1 : i32, i32, i32, i32
  }
  func.func @transform_1(%arg0: i32) -> (i32, i32, i32) {
    %c0_i32 = arith.constant 0 : i32
    %c0_i32_0 = arith.constant 0 : i32
    %c0_i32_1 = arith.constant 0 : i32
    return %arg0, %c0_i32, %c0_i32_0 : i32, i32, i32
  }
}

</mosaic_0001>

<bundles_post_ra>
// kernel: tpu_custom_call.1
= control target key start
LH: loop header
LB: loop body
LE: loop exit
PB: predicated region body
PF: predicated region fallthrough
CT: control target
= control target key end

     0   :  { %6 = vsyncpa [#allocation3], 0  ;;  %s666_s0 = inlined_call_operand.hbm [shape: f32[24,2,2,256], index: 0, kind: input, shape index: {}]   ;;  %s667_s1 = inlined_call_operand.hbm [shape: bf16[24,2,128], index: 1, kind: output, shape index: {}]  }
   0x1   :  { %8 = vsyncpa [#allocation3 + $0x1], 0 }
   0x2   :  { %9 = vsyncpa [#allocation4], 0 }
   0x3   :  { %11 = vsyncpa [#allocation4 + $0x1], 0  ;;  %s487_s6 = smov 0   ;;  %s489_s7 = smov 0  }
   0x4   :  { %s491_s8 = smov 0   ;;  %s493_s9 = smov 0  }
   0x5 LB: > { %s508_s10 = sadd.s32 4294967295, %s469_s9   ;;  %s305_s11 = sadd.s32 4294967294, %s469_s9   ;;  %s469_s9 = sphi %s493_s9, %s679_s9   ;;  %s465_s8 = sphi %s491_s8, %s678_s8   ;;  %s461_s7 = sphi %s489_s7, %s677_s7   ;;  %s457_s6 = sphi %s487_s6, %s676_s6  }
   0x6   : > { %s512_s12 = sadd.s32 1, %s469_s9   ;;  %s24_s13 = sadd.s32 1, %s465_s8 }
   0x7   : > { %s21_s14 = ssub.s32 %s469_s9, %s512_s12  ;;  %p31_p0 = scmp.ne.s32.totalorder %s465_s8, %s461_s7 }
   0x8   : > { %p22_p1 = scmp.eq.s32.totalorder %s21_s14, 0  ;;  %p32_p2 = scmp.eq.s32.totalorder %s469_s9, 0 }
   0x9   : > { %p37_p3 = scmp.ne.s32.totalorder %s461_s7, %s457_s6  ;;  %p38_p4 = scmp.eq.s32.totalorder %s508_s10, 0 }
   0xa   : > { %s524_s15 = scalar_select %p22_p1, %s465_s8, %s24_s13  }
   0xb   : > { %p526_p5 = por %p32_p2, %p31_p0  ;;  %p530_p6 = por %p38_p4, %p37_p3 }
   0xc   : > { %p61_p7 = scmp.eq.s32.totalorder %s508_s10, 2  ;;  %p67_p8 = scmp.eq.s32.totalorder %s305_s11, 2 }
   0xd   : > { %p335_p9 = scmp.lt.s32.totalorder %s469_s9, 3  ;;  %s87_s20 = sand.u32 1, %s465_s8  }
   0xe   : > { %p536_p10 = por %p61_p7, %p31_p0  ;;  %p540_p11 = por %p67_p8, %p37_p3 }
   0xf   : > { %s321_s21 = sshll.u32 %s469_s9, 10  ;;  %s308_s22 = sshll.u32 %s87_s20, 6 }
  0x10   : > { %s671_s18 = scalar_select %p536_p10, 1, 0 }
  0x11   : > { %s672_s19 = scalar_select %p540_p11, 1, 0 }
  0x12   : > { %s549_s25 = scalar_lea.hbm %s666_s0, %s321_s21  ;;  %s91_s26 = scalar_lea.vmem [#allocation2], %s308_s22 }
  0x13   : > { %s99_s27 = sshll.u32 %s91_s26, 4  ;;  %p553_p12 = pnand %p335_p9, %p526_p5  ;;  %s557_s27 = int_to_ptr.vmem [resolvable:$true] %s99_s27 }
  0x14   : > { %s559_s29 = scalar_lea.sflag [#allocation3], %s87_s20  ;;  %s373_s30 = scalar_lea.hbm %s549_s25, 1024 }
  0x15   : > { %p374_p13 = scmp.ne.s32.totalorder %s549_s25, %s373_s30  ;;  %p375_p0 = pneg %p553_p12 }
  0x16   : > { %s378_s4 = scalar_lea.hbm %s666_s0, 3072  ;;  %p379_p3 = scmp.lt.u32.totalorder %s549_s25, %s666_s0 }
  0x17   : > { %p376_p1 = pnand %p375_p0, %p374_p13  ;;  %p380_p4 = scmp.lt.u32.totalorder %s378_s4, %s373_s30 }
  0x18   : > { %p382_p7 = scmp.lt.u32.totalorder %s373_s30, %s549_s25 }
  0x19   : > { %p377_p2 = pneg %p376_p1  ;;  %p381_p5 = por %p380_p4, %p379_p3 }
  0x1b   : > { %p383_p8 = por %p382_p7, %p381_p5 }
  0x1d   : > { %p384_p9 = pnand %p383_p8, %p377_p2 }
  0x1f   : > { %387 = shalt.err (!%p384_p9)
}
  0x20   : > { %s388_s13 = scalar_lea.vmem %s557_s27, 1024  ;;  %s471_s14 = smov [#allocation2]  }
  0x21   : > { %p389_p13 = scmp.ne.s32.totalorder %s557_s27, %s388_s13  ;;  %s393_s16 = sshll.u32 %s471_s14, 4  ;;  %s394_s16 = int_to_ptr.vmem [resolvable:$false] %s393_s16 }
  0x22   : > { %s395_s20 = scalar_lea.vmem %s394_s16, 2048  ;;  %p396_p10 = scmp.lt.s32.totalorder %s557_s27, %s394_s16 }
  0x23   : > { %p391_p1 = pnand %p389_p13, %p375_p0  ;;  %p397_p3 = scmp.lt.s32.totalorder %s395_s20, %s388_s13 }
  0x25   : > { %p392_p11 = pneg %p391_p1  ;;  %p398_p4 = por %p397_p3, %p396_p10 }
  0x27   : > { %p399_p5 = pnand %p398_p4, %p392_p11 }
  0x29   : > { %402 = shalt.err (!%p399_p5)
}
  0x2a   : > { %s472_s21 = smov 64   ;;  %s473_s22 = smov 4  }
  0x2b   : > { %330 = dma.hbm_to_vmem [thread:$0]  (!%p553_p12), %s549_s25, 1024, %s557_s27, %s559_s29, %s472_s21, %s472_s21, %s473_s22  }
  0x2c   : > { %p312_p0 = scmp.ge.s32.totalorder %s469_s9, 1  ;;  %p107_p2 = scmp.lt.s32.totalorder %s469_s9, 4 }
  0x2e   : > { %p108_p7 = pnand %p312_p0, %p107_p2 }
  0x2f   : > { %s590_s23 = sand.u32 (!%p108_p7), 1, %s461_s7  }
  0x30   : > { %111 = sbr.rel (%p108_p7) target bundleno = 89 (0x59), region = 24  ;;  %s313_s24 = sshll.u32 (!%p108_p7), %s590_s23, 6 }
  0x31   : > { %s114_s26 = scalar_lea.sflag (!%p108_p7), [#allocation3], %s590_s23  ;;  %s594_s30 = scalar_lea.vmem (!%p108_p7), [#allocation2], %s313_s24 }
  0x37   : > { %448 = dma.done.wait (%p530_p6), %s114_s26, 1024  }
  0x38   : > { %450 = vsyncadd (%p530_p6), %s114_s26, 4294966272  ;;  %v138_v0 = vld [vmem:[%s594_s30] sm:$0xf]  ;;  %v139_v1 = vld [vmem:[%s594_s30 + $0x4] sm:$0xf]  ;;  %s314_s17 = sshll.u32 %s590_s23, 3 }
  0x39   : > { %v140_v2 = vld [vmem:[%s594_s30 + $0x8] sm:$0xf]  ;;  %v154_v3 = vadd.f32 %v139_v1, %v138_v0  ;;  %v141_v4 = vld [vmem:[%s594_s30 + $0xc] sm:$0xf]  ;;  %v142_v5 = vld [vmem:[%s594_s30 + $0x10] sm:$0xf] }
  0x3a   : > { %v143_v6 = vld [vmem:[%s594_s30 + $0x14] sm:$0xf]  ;;  %v155_v7 = vadd.f32 %v141_v4, %v140_v2  ;;  %v144_v9 = vld [vmem:[%s594_s30 + $0x18] sm:$0xf]  ;;  %v145_v10 = vld [vmem:[%s594_s30 + $0x1c] sm:$0xf] }
  0x3b   : > { %v156_v8 = vadd.f32 %v143_v6, %v142_v5  ;;  %v146_v11 = vld [vmem:[%s594_s30 + $0x20] sm:$0xf]  ;;  %v170_v12 = vrot.slane %v154_v3, 2  ;;  %v157_v13 = vadd.f32 %v145_v10, %v144_v9  ;;  %v147_v14 = vld [vmem:[%s594_s30 + $0x24] sm:$0xf]  ;;  %s135_s25 = scalar_lea.vmem [#allocation5], %s314_s17 }
  0x3c   : > { %v148_v15 = vld [vmem:[%s594_s30 + $0x28] sm:$0xf]  ;;  %v171_v16 = vrot.slane %v155_v7, 2  ;;  %v158_v18 = vadd.f32 %v147_v14, %v146_v11  ;;  %v149_v19 = vld [vmem:[%s594_s30 + $0x2c] sm:$0xf]  ;;  %s232_s27 = sshll.u32 %s135_s25, 4  ;;  %s618_s27 = int_to_ptr.vmem [resolvable:$true] %s232_s27 }
  0x3d   : > { %v172_v17 = vrot.slane %v156_v8, 2  ;;  %v150_v20 = vld [vmem:[%s594_s30 + $0x30] sm:$0xf]  ;;  %v186_v21 = vadd.f32 %v170_v12, %v154_v3  ;;  %v173_v22 = vrot.slane %v157_v13, 2  ;;  %v159_v23 = vadd.f32 %v149_v19, %v148_v15  ;;  %v151_v24 = vld [vmem:[%s594_s30 + $0x34] sm:$0xf] }
  0x3e   : > { %v152_v25 = vld [vmem:[%s594_s30 + $0x38] sm:$0xf]  ;;  %v187_v26 = vadd.f32 %v171_v16, %v155_v7  ;;  %v174_v28 = vrot.slane %v158_v18, 2  ;;  %v160_v29 = vadd.f32 %v151_v24, %v150_v20  ;;  %v153_v30 = vld [vmem:[%s594_s30 + $0x3c] sm:$0xf]  ;;  %s322_s28 = sshll.u32 %s508_s10, 7 }
  0x3f   : > { %v188_v27 = vadd.f32 %v172_v17, %v156_v8  ;;  %v194_v31 = vmul.f32 0.25, %v186_v21  ;;  %v189_v32 = vadd.f32 %v173_v22, %v157_v13  ;;  %v175_v33 = vrot.slane %v159_v23, 2  ;;  %s623_s10 = scalar_lea.hbm %s667_s1, %s322_s28  ;;  %s219_s3 = scalar_lea.sflag [#allocation4], %s590_s23 }
  0x40   : > { %v161_v34 = vadd.f32 %v153_v30, %v152_v25  ;;  %v195_v35 = vmul.f32 0.25, %v187_v26  ;;  %v190_v37 = vadd.f32 %v174_v28, %v158_v18  ;;  %v176_v38 = vrot.slane %v160_v29, 2  ;;  %s403_s4 = scalar_lea.vmem %s618_s27, 128  ;;  %p674_p10 = scmp.ne.s32.totalorder %s671_s18, 0 }
  0x41   : > { %v196_v36 = vmul.f32 0.25, %v188_v27  ;;  %v202_v39 = vpack.c.bf16 %v194_v31, %v194_v31  ;;  %v197_v40 = vmul.f32 0.25, %v189_v32  ;;  %v191_v41 = vadd.f32 %v175_v33, %v159_v23  ;;  %p404_p6 = scmp.ne.s32.totalorder %s618_s27, %s403_s4  ;;  %s474_s5 = smov [#allocation5]  }
  0x42   : > { %v177_v42 = vrot.slane %v161_v34, 2  ;;  %v203_v43 = vpack.c.bf16 %v195_v35, %v195_v35  ;;  %v198_v45 = vmul.f32 0.25, %v190_v37  ;;  %v192_v46 = vadd.f32 %v176_v38, %v160_v29  ;;  %s407_s11 = sshll.u32 %s474_s5, 4  ;;  %s408_s11 = int_to_ptr.vmem [resolvable:$false] %s407_s11 }
  0x43   : > { %v204_v44 = vpack.c.bf16 %v196_v36, %v196_v36  ;;  %210 = vst [vmem:[%s135_s25] sm:$0x1] %v202_v39  ;;  %v205_v47 = vpack.c.bf16 %v197_v40, %v197_v40  ;;  %v199_v48 = vmul.f32 0.25, %v191_v41  ;;  %p405_p11 = pnand %p404_p6, %p674_p10  ;;  %s409_s13 = scalar_lea.vmem %s408_s11, 256 }
  0x44   : > { %v193_v49 = vadd.f32 %v177_v42, %v161_v34  ;;  %211 = vst [vmem:[%s135_s25 + $0x1] sm:$0x1] %v203_v43  ;;  %v206_v50 = vpack.c.bf16 %v198_v45, %v198_v45  ;;  %v200_v51 = vmul.f32 0.25, %v192_v46  ;;  %p410_p8 = scmp.lt.s32.totalorder %s618_s27, %s408_s11  ;;  %p411_p9 = scmp.lt.s32.totalorder %s409_s13, %s403_s4 }
  0x45   : > { %212 = vst [vmem:[%s135_s25 + $0x2] sm:$0x1] %v204_v44  ;;  %213 = vst [vmem:[%s135_s25 + $0x3] sm:$0x1] %v205_v47  ;;  %v207_v52 = vpack.c.bf16 %v199_v48, %v199_v48  ;;  %p406_p12 = pneg %p405_p11 }
  0x46   : > { %v201_v53 = vmul.f32 0.25, %v193_v49  ;;  %214 = vst [vmem:[%s135_s25 + $0x4] sm:$0x1] %v206_v50  ;;  %v208_v54 = vpack.c.bf16 %v200_v51, %v200_v51  ;;  %p412_p13 = por %p411_p9, %p410_p8 }
  0x47   : > { %215 = vst [vmem:[%s135_s25 + $0x5] sm:$0x1] %v207_v52 }
  0x48   : > { %v209_v55 = vpack.c.bf16 %v201_v53, %v201_v53  ;;  %216 = vst [vmem:[%s135_s25 + $0x6] sm:$0x1] %v208_v54  ;;  %p413_p1 = pnand %p412_p13, %p406_p12 }
  0x4a   : > { %217 = vst [vmem:[%s135_s25 + $0x7] sm:$0x1] %v209_v55 }
  0x4b   : > { %416 = shalt.err (!%p413_p1)
}
  0x4c   : > { %s417_s14 = scalar_lea.hbm %s623_s10, 128  ;;  %s421_s21 = scalar_lea.hbm %s667_s1, 384 }
  0x4d   : > { %p418_p3 = scmp.ne.s32.totalorder %s623_s10, %s417_s14  ;;  %p422_p0 = scmp.lt.u32.totalorder %s623_s10, %s667_s1 }
  0x4e   : > { %p423_p2 = scmp.lt.u32.totalorder %s421_s21, %s417_s14  ;;  %p425_p6 = scmp.lt.u32.totalorder %s417_s14, %s623_s10 }
  0x4f   : > { %p419_p4 = pnand %p418_p3, %p674_p10 }
  0x50   : > { %p424_p7 = por %p423_p2, %p422_p0 }
  0x51   : > { %p420_p5 = pneg %p419_p4 }
  0x52   : > { %p426_p11 = por %p425_p6, %p424_p7 }
  0x54   : > { %p427_p12 = pnand %p426_p11, %p420_p5 }
  0x56   : > { %430 = shalt.err (!%p427_p12)
}
  0x57   : > { %s475_s26 = smov 16   ;;  %s476_s30 = smov 1  }
  0x58   : > { %325 = dma.vmem_to_hbm [thread:$0]  (%p674_p10), %s618_s27, 128, %s623_s10, %s219_s3, %s475_s26, %s475_s26, %s476_s30  }
  0x59 PF: > { %p336_p8 = scmp.ge.s32.totalorder %s469_s9, 2  ;;  %s247_s17 = sand.u32 1, %s457_s6  }
  0x5a   : > { %p675_p9 = scmp.ne.s32.totalorder %s672_s19, 0  ;;  %s248_s25 = scalar_lea.sflag [#allocation4], %s247_s17 }
  0x5c   : > { %p332_p13 = pnand %p336_p8, %p675_p9 }
  0x5e   : > { %452 = dma.done.wait (!%p332_p13), %s248_s25, 128  }
  0x5f   : > { %454 = vsyncadd (!%p332_p13), %s248_s25, 4294967168  ;;  %p14_p1 = scmp.ge.s32.totalorder %s512_s12, 5   ;;  %s676_s6 = smov %s461_s7 }
  0x60   : > { %s677_s7 = smov %s465_s8  ;;  %s678_s8 = smov %s524_s15 }
  0x61   : > { %s679_s9 = smov %s512_s12  ;;  %16 = sbr.rel (!%p14_p1) target bundleno = 5 (0x5), region = 69 }
  0x68   :  { %253 = vsyncpa [#allocation3], 1 }
  0x69   :  { %255 = vsyncpa [#allocation3 + $0x1], 1 }
  0x6a   :  { %256 = vsyncpa [#allocation4], 1 }
  0x6b   :  { %258 = vsyncpa [#allocation4 + $0x1], 1 }

</bundles_post_ra>
